<compile_context>
chip_gen: v7x
topology: tpu7x:2x2x1
jax: 0.10.0
libtpu: 0.0.40
codegen_flags: <defaults>
</compile_context>

<pallas_src>
import functools
import math

import jax
import jax.numpy as jnp
from jax import lax
from jax.experimental import pallas as pl
from jax.experimental.pallas import tpu as pltpu


def _g_attention_kernel(x_ref, w_ref, o_ref, *, compute_dtype):
    """One batch element.

    x_ref: (N, Dp) f32 input, features zero-padded beyond the true dct_n.
    w_ref: (Dp, 2*Dp) fused weights [Wq Wk^T / sqrt(D) | Wv] in compute_dtype,
           zero-padded so the Wv half starts at lane column Dp (multiple of 128).
    """
    x = x_ref[...]                      # f32 residual input
    w = w_ref[...]                      # fused weights (already compute_dtype)
    _, dp = x.shape

    y = x
    for _ in range(3):                  # three shared-weight attention passes
        yc = y.astype(compute_dtype)
        mv = jnp.dot(yc, w, preferred_element_type=jnp.float32)      # (N, 2*Dp)
        ym = mv[:, :dp]                 # y @ (Wq Wk^T / sqrt(D))  lane-aligned slice
        v = mv[:, dp:]                  # y @ Wv                   lane-aligned slice

        # Contract the feature dim of both operands directly: no transpose, the
        # MXU consumes the transposed operand natively.
        s = lax.dot_general(
            ym.astype(compute_dtype), yc,
            dimension_numbers=(((1,), (1,)), ((), ())),
            preferred_element_type=jnp.float32)                      # (N, N)

        # Softmax kept entirely in f32 (v5e has no bf16 VPU/EUP).
        s = s - jnp.max(s, axis=-1, keepdims=True)
        p = jnp.exp(s)
        # EUP reciprocal + VPU multiply instead of a VALU divide.  There is no
        # mask, so every row has a 1.0 term and the sum can never be zero.
        p = p * pl.reciprocal(jnp.sum(p, axis=-1, keepdims=True), approx=True)

        y = jnp.dot(p.astype(compute_dtype), v.astype(compute_dtype),
                    preferred_element_type=jnp.float32)              # (N, Dp)

    o_ref[...] = (y + x).astype(o_ref.dtype)


def _round_up(v, m):
    return (v + m - 1) // m * m


@functools.partial(jax.jit, static_argnames=("use_bf16_mxu",))
def g_attention(x, wq, wk, wv, *, use_bf16_mxu=True):
    """x: (B, N, D) = (batch, graph nodes, dct_n); wq/wk/wv: (D, D) shared weights."""
    B, N, D = x.shape
    Dp = _round_up(D, 128)              # lane-dense padded feature dim
    scale = 1.0 / math.sqrt(D)
    compute_dtype = jnp.bfloat16 if use_bf16_mxu else jnp.float32

    # Pre-associate M = Wq Wk^T / sqrt(D) (drops one matmul per pass) and fuse it
    # with Wv into a single (Dp, 2*Dp) RHS.  Zero-padding places the Wv half at
    # lane column Dp, so both halves of the projection slice on vreg boundaries.
    m = (wq @ wk.T) * scale
    pad = ((0, Dp - D), (0, Dp - D))
    w = jnp.concatenate([jnp.pad(m, pad), jnp.pad(wv, pad)], axis=1)
    w = w.astype(compute_dtype)

    x_pad = jnp.pad(x, ((0, 0), (0, 0), (0, Dp - D)))

    out = pl.pallas_call(
        functools.partial(_g_attention_kernel, compute_dtype=compute_dtype),
        out_shape=jax.ShapeDtypeStruct((B, N, Dp), x.dtype),
        grid=(B,),
        in_specs=[
            pl.BlockSpec((None, N, Dp), lambda b: (b, 0, 0)),   # per-batch x tile
            pl.BlockSpec((Dp, 2 * Dp), lambda b: (0, 0)),       # shared fused weights
        ],
        out_specs=pl.BlockSpec((None, N, Dp), lambda b: (b, 0, 0)),
        # Residual input and output share an HBM buffer; the residual is read from
        # the VMEM copy before the output block is written back.
        input_output_aliases={0: 0},
        compiler_params=pltpu.CompilerParams(
            # Batch steps are independent -> shard across v7x's two TensorCores.
            dimension_semantics=("parallel",),
            # Budgeted under v7x's 64 MiB physical VMEM (v5e/v6e have 128 MiB).
            vmem_limit_bytes=48 * 1024 * 1024,
        ),
    )(x_pad, w)

    return out[:, :, :D]


def _reference(x, wq, wk, wv):
    """Pure-JAX f32 reference for correctness check."""
    scale = 1.0 / math.sqrt(x.shape[-1])

    def one_pass(y):
        q = y @ wq
        k = y @ wk
        v = y @ wv
        s = jnp.einsum("bnd,bmd->bnm", q, k) * scale
        p = jax.nn.softmax(s, axis=-1)
        return jnp.einsum("bnm,bmd->bnd", p, v)

    y = x
    for _ in range(3):
        y = one_pass(y)
    return y + x


if __name__ == "__main__":
    B, N, D = 2, 8, 32  # batch, graph nodes, dct_n

    key = jax.random.PRNGKey(0)
    kx, kq, kk, kv = jax.random.split(key, 4)

    x = jax.random.normal(kx, (B, N, D), dtype=jnp.float32)

    # Deterministic nn.Linear-style init: U(-1/sqrt(D), 1/sqrt(D)).
    bound = 1.0 / math.sqrt(D)
    wq = jax.random.uniform(kq, (D, D), jnp.float32, -bound, bound)
    wk = jax.random.uniform(kk, (D, D), jnp.float32, -bound, bound)
    wv = jax.random.uniform(kv, (D, D), jnp.float32, -bound, bound)

    ref = _reference(x, wq, wk, wv)

    # f32-MXU path: tight check (only approx-reciprocal + pre-associated Wq Wk^T
    # change the f32 rounding order vs the reference).
    out_f32 = jax.block_until_ready(g_attention(x, wq, wk, wv, use_bf16_mxu=False))
    assert out_f32.shape == (B, N, D)
    assert jnp.allclose(out_f32, ref, atol=5e-3, rtol=5e-3), float(
        jnp.max(jnp.abs(out_f32 - ref)))

    # bf16-MXU path (default, for v6e/v7x throughput): slightly looser check since
    # bf16 operand rounding compounds across the three shared-weight passes
    # (accumulation and softmax stay f32).
    out_bf16 = jax.block_until_ready(g_attention(x, wq, wk, wv, use_bf16_mxu=True))
    assert out_bf16.shape == (B, N, D)
    assert jnp.allclose(out_bf16, ref, atol=3e-2, rtol=3e-2), float(
        jnp.max(jnp.abs(out_bf16 - ref)))

    print("KERNEL_OK")
</pallas_src>

<mosaic_0001>
module attributes {stable_mosaic.version = 11 : i64} {
  func.func @_g_attention_kernel(%arg0: i32, %arg1: memref<1x8x128xf32, #tpu.memory_space<vmem>>, %arg2: memref<128x256xf32, #tpu.memory_space<vmem>>, %arg3: memref<1x8x128xf32, #tpu.memory_space<vmem>>) attributes {dimension_semantics = [#tpu.dimension_semantics<parallel>], iteration_bounds = array<i64: 2>, scalar_prefetch = 0 : i64, scratch_operands = 0 : i64, tpu.core_type = #tpu.core_type<tc>, window_params = [{transform_indices = @transform_0, window_bounds = array<i64: 1, 8, 128>}, {pipeline_mode = #tpu.pipeline_mode<synchronous>, transform_indices = @transform_1, window_bounds = array<i64: 128, 256>}, {transform_indices = @transform_2, window_bounds = array<i64: 1, 8, 128>}]} {
    %c0 = arith.constant 0 : index
    %c0_0 = arith.constant 0 : index
    %c0_1 = arith.constant 0 : index
    %0 = vector.load %arg1[%c0, %c0_0, %c0_1] : memref<1x8x128xf32, #tpu.memory_space<vmem>>, vector<1x8x128xf32>
    %1 = vector.shape_cast %0 : vector<1x8x128xf32> to vector<8x128xf32>
    %c0_2 = arith.constant 0 : index
    %c0_3 = arith.constant 0 : index
    %2 = vector.load %arg2[%c0_2, %c0_3] : memref<128x256xf32, #tpu.memory_space<vmem>>, vector<128x256xf32>
    %cst = arith.constant dense<0.000000e+00> : vector<8x256xf32>
    %3 = tpu.matmul %1, %2, %cst {dimension_numbers = #tpu.dot_dimension_numbers<[1], [0], [0], [1], [0, 0, 1, 1], [], []>} : vector<8x128xf32>, vector<128x256xf32>, vector<8x256xf32> -> vector<8x256xf32>
    %4 = vector.extract_strided_slice %3 {offsets = [0, 0], sizes = [8, 128], strides = [1, 1]} : vector<8x256xf32> to vector<8x128xf32>
    %5 = vector.extract_strided_slice %3 {offsets = [0, 128], sizes = [8, 128], strides = [1, 1]} : vector<8x256xf32> to vector<8x128xf32>
    %cst_4 = arith.constant dense<0.000000e+00> : vector<8x8xf32>
    %6 = tpu.matmul %4, %1, %cst_4 {dimension_numbers = #tpu.dot_dimension_numbers<[1], [1], [0], [0], [0, 0, 1, 0], [], []>} : vector<8x128xf32>, vector<8x128xf32>, vector<8x8xf32> -> vector<8x8xf32>
    %cst_5 = arith.constant dense<0xFF800000> : vector<8xf32>
    %7 = vector.multi_reduction <maximumf>, %6, %cst_5 [1] : vector<8x8xf32> to vector<8xf32>
    %8 = vector.shape_cast %7 : vector<8xf32> to vector<8x1xf32>
    %9 = vector.broadcast %8 : vector<8x1xf32> to vector<8x8xf32>
    %10 = arith.subf %6, %9 : vector<8x8xf32>
    %11 = math.exp %10 : vector<8x8xf32>
    %cst_6 = arith.constant dense<0.000000e+00> : vector<8xf32>
    %12 = vector.multi_reduction <add>, %11, %cst_6 [1] : vector<8x8xf32> to vector<8xf32>
    %13 = vector.shape_cast %12 : vector<8xf32> to vector<8x1xf32>
    %14 = tpu.reciprocal %13 {approx = true} : vector<8x1xf32> -> vector<8x1xf32>
    %15 = vector.broadcast %14 : vector<8x1xf32> to vector<8x8xf32>
    %16 = arith.mulf %11, %15 : vector<8x8xf32>
    %cst_7 = arith.constant dense<0.000000e+00> : vector<8x128xf32>
    %17 = tpu.matmul %16, %5, %cst_7 {dimension_numbers = #tpu.dot_dimension_numbers<[1], [0], [0], [1], [0, 0, 1, 1], [], []>} : vector<8x8xf32>, vector<8x128xf32>, vector<8x128xf32> -> vector<8x128xf32>
    %cst_8 = arith.constant dense<0.000000e+00> : vector<8x256xf32>
    %18 = tpu.matmul %17, %2, %cst_8 {dimension_numbers = #tpu.dot_dimension_numbers<[1], [0], [0], [1], [0, 0, 1, 1], [], []>} : vector<8x128xf32>, vector<128x256xf32>, vector<8x256xf32> -> vector<8x256xf32>
    %19 = vector.extract_strided_slice %18 {offsets = [0, 0], sizes = [8, 128], strides = [1, 1]} : vector<8x256xf32> to vector<8x128xf32>
    %20 = vector.extract_strided_slice %18 {offsets = [0, 128], sizes = [8, 128], strides = [1, 1]} : vector<8x256xf32> to vector<8x128xf32>
    %cst_9 = arith.constant dense<0.000000e+00> : vector<8x8xf32>
    %21 = tpu.matmul %19, %17, %cst_9 {dimension_numbers = #tpu.dot_dimension_numbers<[1], [1], [0], [0], [0, 0, 1, 0], [], []>} : vector<8x128xf32>, vector<8x128xf32>, vector<8x8xf32> -> vector<8x8xf32>
    %cst_10 = arith.constant dense<0xFF800000> : vector<8xf32>
    %22 = vector.multi_reduction <maximumf>, %21, %cst_10 [1] : vector<8x8xf32> to vector<8xf32>
    %23 = vector.shape_cast %22 : vector<8xf32> to vector<8x1xf32>
    %24 = vector.broadcast %23 : vector<8x1xf32> to vector<8x8xf32>
    %25 = arith.subf %21, %24 : vector<8x8xf32>
    %26 = math.exp %25 : vector<8x8xf32>
    %cst_11 = arith.constant dense<0.000000e+00> : vector<8xf32>
    %27 = vector.multi_reduction <add>, %26, %cst_11 [1] : vector<8x8xf32> to vector<8xf32>
    %28 = vector.shape_cast %27 : vector<8xf32> to vector<8x1xf32>
    %29 = tpu.reciprocal %28 {approx = true} : vector<8x1xf32> -> vector<8x1xf32>
    %30 = vector.broadcast %29 : vector<8x1xf32> to vector<8x8xf32>
    %31 = arith.mulf %26, %30 : vector<8x8xf32>
    %cst_12 = arith.constant dense<0.000000e+00> : vector<8x128xf32>
    %32 = tpu.matmul %31, %20, %cst_12 {dimension_numbers = #tpu.dot_dimension_numbers<[1], [0], [0], [1], [0, 0, 1, 1], [], []>} : vector<8x8xf32>, vector<8x128xf32>, vector<8x128xf32> -> vector<8x128xf32>
    %cst_13 = arith.constant dense<0.000000e+00> : vector<8x256xf32>
    %33 = tpu.matmul %32, %2, %cst_13 {dimension_numbers = #tpu.dot_dimension_numbers<[1], [0], [0], [1], [0, 0, 1, 1], [], []>} : vector<8x128xf32>, vector<128x256xf32>, vector<8x256xf32> -> vector<8x256xf32>
    %34 = vector.extract_strided_slice %33 {offsets = [0, 0], sizes = [8, 128], strides = [1, 1]} : vector<8x256xf32> to vector<8x128xf32>
    %35 = vector.extract_strided_slice %33 {offsets = [0, 128], sizes = [8, 128], strides = [1, 1]} : vector<8x256xf32> to vector<8x128xf32>
    %cst_14 = arith.constant dense<0.000000e+00> : vector<8x8xf32>
    %36 = tpu.matmul %34, %32, %cst_14 {dimension_numbers = #tpu.dot_dimension_numbers<[1], [1], [0], [0], [0, 0, 1, 0], [], []>} : vector<8x128xf32>, vector<8x128xf32>, vector<8x8xf32> -> vector<8x8xf32>
    %cst_15 = arith.constant dense<0xFF800000> : vector<8xf32>
    %37 = vector.multi_reduction <maximumf>, %36, %cst_15 [1] : vector<8x8xf32> to vector<8xf32>
    %38 = vector.shape_cast %37 : vector<8xf32> to vector<8x1xf32>
    %39 = vector.broadcast %38 : vector<8x1xf32> to vector<8x8xf32>
    %40 = arith.subf %36, %39 : vector<8x8xf32>
    %41 = math.exp %40 : vector<8x8xf32>
    %cst_16 = arith.constant dense<0.000000e+00> : vector<8xf32>
    %42 = vector.multi_reduction <add>, %41, %cst_16 [1] : vector<8x8xf32> to vector<8xf32>
    %43 = vector.shape_cast %42 : vector<8xf32> to vector<8x1xf32>
    %44 = tpu.reciprocal %43 {approx = true} : vector<8x1xf32> -> vector<8x1xf32>
    %45 = vector.broadcast %44 : vector<8x1xf32> to vector<8x8xf32>
    %46 = arith.mulf %41, %45 : vector<8x8xf32>
    %cst_17 = arith.constant dense<0.000000e+00> : vector<8x128xf32>
    %47 = tpu.matmul %46, %35, %cst_17 {dimension_numbers = #tpu.dot_dimension_numbers<[1], [0], [0], [1], [0, 0, 1, 1], [], []>} : vector<8x8xf32>, vector<8x128xf32>, vector<8x128xf32> -> vector<8x128xf32>
    %48 = arith.addf %47, %1 : vector<8x128xf32>
    %c0_18 = arith.constant 0 : index
    %c0_19 = arith.constant 0 : index
    %c0_20 = arith.constant 0 : index
    %49 = vector.load %arg3[%c0_18, %c0_19, %c0_20] : memref<1x8x128xf32, #tpu.memory_space<vmem>>, vector<1x8x128xf32>
    %50 = vector.shape_cast %49 : vector<1x8x128xf32> to vector<8x128xf32>
    %51 = vector.shape_cast %48 : vector<8x128xf32> to vector<1x8x128xf32>
    tpu.vector_store %arg3[%c0_18, %c0_19, %c0_20], %51 {strides = array<i32>} : memref<1x8x128xf32, #tpu.memory_space<vmem>>, vector<1x8x128xf32>,
    return
  }
  func.func @transform_0(%arg0: i32) -> (i32, i32, i32) {
    %c0_i32 = arith.constant 0 : i32
    %c0_i32_0 = arith.constant 0 : i32
    %c0_i32_1 = arith.constant 0 : i32
    return %arg0, %c0_i32, %c0_i32_0 : i32, i32, i32
  }
  func.func @transform_1(%arg0: i32) -> (i32, i32) {
    %c0_i32 = arith.constant 0 : i32
    %c0_i32_0 = arith.constant 0 : i32
    %c0_i32_1 = arith.constant 0 : i32
    return %c0_i32, %c0_i32_0 : i32, i32
  }
  func.func @transform_2(%arg0: i32) -> (i32, i32, i32) {
    %c0_i32 = arith.constant 0 : i32
    %c0_i32_0 = arith.constant 0 : i32
    %c0_i32_1 = arith.constant 0 : i32
    return %arg0, %c0_i32, %c0_i32_0 : i32, i32, i32
  }
}

</mosaic_0001>

<bundles_post_ra>
// kernel: g_attention.1
= control target key start
LH: loop header
LB: loop body
LE: loop exit
PB: predicated region body
PF: predicated region fallthrough
CT: control target
= control target key end

     0   :  { %s1099_s9 = smov 0   ;;  %s1329_s0 = inlined_call_operand.vmem [shape: f32[2,8,128], index: 0, kind: input, shape index: {}, may-alias: {0,2}]   ;;  %s1330_s1 = inlined_call_operand.vmem [shape: f32[128,256], index: 1, kind: input, shape index: {}]   ;;  %s1331_s2 = inlined_call_operand.vmem [shape: f32[2,8,128], index: 2, kind: output, shape index: {}, may-alias: {0,2}]  }
   0x1 LB: > { %s902_s10 = sadd.s32 4294967295, %s1080_s9   ;;  %p906_p0 = scmp.ge.s32.totalorder %s1080_s9, 1  ;;  %s1080_s9 = sphi %s1099_s9, %s12_s9  }
   0x2   : > { %p111_p1 = scmp.lt.s32.totalorder %s1080_s9, 3 }
   0x4   : > { %p112_p2 = pnand %p906_p0, %p111_p1 }
   0x5   : > { %v141_v0 = vld [vmem:[%s1330_s1 + $0x8] sm:$0xff] (!%p112_p2)  ;;  %v143_v1 = vld [vmem:[%s1330_s1 + $0x18] sm:$0xff] (!%p112_p2)  ;;  %v140_v2 = vld [vmem:[%s1330_s1] sm:$0xff] (!%p112_p2)  ;;  %p131_p3 = scmp.lt.s32.totalorder (!%p112_p2), %s902_s10, 1  ;;  %v1082_v7 = vmov (!%p112_p2), 0.0   ;;  %vm1083_vm0 = vmmov (!%p112_p2), 0  }
   0x6   : > { %115 = sbr.rel (%p112_p2) target bundleno = 2893 (0xb4d), region = 28  ;;  %v1116_v3 = vpack.c.bf16 (!%p112_p2), %v143_v1, %v141_v0  ;;  %v142_v4 = vld [vmem:[%s1330_s1 + $0x10] sm:$0xff] (!%p112_p2)  ;;  %v145_v5 = vld [vmem:[%s1330_s1 + $0x28] sm:$0xff] (!%p112_p2)  ;;  %v147_v6 = vld [vmem:[%s1330_s1 + $0x38] sm:$0xff] (!%p112_p2)  ;;  %236 = vmatprep.mubr.f32.mxu0 (!%p112_p2), %v1082_v7  ;;  %926 = vmatprep.subr.mxu1 (!%p112_p2), %v1082_v7  ;;  %vm313_vm1 = vcmask (!%p112_p2), 64512  }
   0x7   : > { %v1129_v8 = vpack.c.bf16 (!%p112_p2), %v142_v4, %v140_v2  ;;  %v1131_v9 = vpack.c.bf16 (!%p112_p2), %v147_v6, %v145_v5  ;;  %v144_v10 = vld [vmem:[%s1330_s1 + $0x20] sm:$0xff] (!%p112_p2)  ;;  %v146_v11 = vld [vmem:[%s1330_s1 + $0x30] sm:$0xff] (!%p112_p2)  ;;  %v149_v12 = vld [vmem:[%s1330_s1 + $0x48] sm:$0xff] (!%p112_p2)  ;;  %928 = vmatprep.mubr.msk.f32.mxu1 (!%p112_p2), %vm1083_vm0, %v1082_v7 }
   0x8   : > { %957 = vmatprep.subr.bf16.mxu0 (!%p112_p2), %v1116_v3  ;;  %v151_v13 = vld [vmem:[%s1330_s1 + $0x58] sm:$0xff] (!%p112_p2)  ;;  %v1149_v14 = vpack.c.bf16 (!%p112_p2), %v146_v11, %v144_v10  ;;  %v148_v16 = vld [vmem:[%s1330_s1 + $0x40] sm:$0xff] (!%p112_p2)  ;;  %v150_v17 = vld [vmem:[%s1330_s1 + $0x50] sm:$0xff] (!%p112_p2) }
   0x9   : > { %959 = vmatpush1.bf16.msra.mxu0 (!%p112_p2), %v1129_v8  ;;  %v1153_v15 = vpack.c.bf16 (!%p112_p2), %v151_v13, %v149_v12  ;;  %v153_v18 = vld [vmem:[%s1330_s1 + $0x68] sm:$0xff] (!%p112_p2)  ;;  %v155_v19 = vld [vmem:[%s1330_s1 + $0x78] sm:$0xff] (!%p112_p2)  ;;  %v1173_v20 = vpack.c.bf16 (!%p112_p2), %v150_v17, %v148_v16  ;;  %v152_v22 = vld [vmem:[%s1330_s1 + $0x60] sm:$0xff] (!%p112_p2) }
   0xa   : > { %961 = vmatprep.subr.bf16.mxu0 (!%p112_p2), %v1131_v9  ;;  %v1176_v21 = vpack.c.bf16 (!%p112_p2), %v155_v19, %v153_v18  ;;  %v154_v23 = vld [vmem:[%s1330_s1 + $0x70] sm:$0xff] (!%p112_p2)  ;;  %v157_v24 = vld [vmem:[%s1330_s1 + $0x88] sm:$0xff] (!%p112_p2)  ;;  %v159_v25 = vld [vmem:[%s1330_s1 + $0x98] sm:$0xff] (!%p112_p2) }
   0xb   : > { %v1194_v27 = vpack.c.bf16 (!%p112_p2), %v154_v23, %v152_v22  ;;  %v1198_v28 = vpack.c.bf16 (!%p112_p2), %v159_v25, %v157_v24  ;;  %v156_v29 = vld [vmem:[%s1330_s1 + $0x80] sm:$0xff] (!%p112_p2)  ;;  %v158_v30 = vld [vmem:[%s1330_s1 + $0x90] sm:$0xff] (!%p112_p2)  ;;  %v161_v31 = vld [vmem:[%s1330_s1 + $0xa8] sm:$0xff] (!%p112_p2) }
   0xc   : > { %v163_v32 = vld [vmem:[%s1330_s1 + $0xb8] sm:$0xff] (!%p112_p2)  ;;  %v1213_v33 = vpack.c.bf16 (!%p112_p2), %v158_v30, %v156_v29  ;;  %v160_v35 = vld [vmem:[%s1330_s1 + $0xa0] sm:$0xff] (!%p112_p2)  ;;  %v162_v36 = vld [vmem:[%s1330_s1 + $0xb0] sm:$0xff] (!%p112_p2) }
   0xd   : > { %s1333_s10 = smov (!%p131_p3, %s902_s10), 1  ;;  %963 = vmatpush1.bf16.msra.mxu0 %v1149_v14  ;;  %v1216_v34 = vpack.c.bf16 %v163_v32, %v161_v31  ;;  %v165_v37 = vld [vmem:[%s1330_s1 + $0xc8] sm:$0xff]  ;;  %v167_v38 = vld [vmem:[%s1330_s1 + $0xd8] sm:$0xff]  ;;  %v1231_v39 = vpack.c.bf16 %v162_v36, %v160_v35  ;;  %v164_v41 = vld [vmem:[%s1330_s1 + $0xc0] sm:$0xff] }
   0xe   : > { %s907_s3 = sshll.u32 %s1333_s10, 3  ;;  %965 = vmatprep.subr.bf16.mxu0 %v1153_v15  ;;  %v1234_v40 = vpack.c.bf16 %v167_v38, %v165_v37  ;;  %v166_v42 = vld [vmem:[%s1330_s1 + $0xd0] sm:$0xff]  ;;  %v169_v43 = vld [vmem:[%s1330_s1 + $0xe8] sm:$0xff]  ;;  %v171_v44 = vld [vmem:[%s1330_s1 + $0xf8] sm:$0xff] }
   0xf   : > { %s134_s16 = scalar_lea.vmem %s1329_s0, %s907_s3  ;;  %v1249_v45 = vpack.c.bf16 %v166_v42, %v164_v41  ;;  %v1252_v46 = vpack.c.bf16 %v171_v44, %v169_v43  ;;  %v168_v47 = vld [vmem:[%s1330_s1 + $0xe0] sm:$0xff]  ;;  %v170_v48 = vld [vmem:[%s1330_s1 + $0xf0] sm:$0xff]  ;;  %s138_s30 = scalar_lea.vmem %s1331_s2, %s907_s3 }
  0x10   : > { %v1190_v26 = vld [vmem:[%s134_s16] sm:$0xff]  ;;  %v986_v49 = vpack.c.bf16 %v170_v48, %v168_v47 }
  0x11   : > { %927 = vmatpush3.xpose.msra.mxu1 %v1190_v26  ;;  %967 = vmatpush1.bf16.msra.mxu0 %v1173_v20 }
  0x12   : > { %931 = vmatprep.subr.mxu1 %v1082_v7  ;;  %969 = vmatprep.subr.bf16.mxu0 %v1176_v21 }
  0x15   : > { %971 = vmatpush1.bf16.msra.mxu0 %v1194_v27 }
  0x16   : > { %973 = vmatprep.subr.bf16.mxu0 %v1198_v28 }
  0x19   : > { %975 = vmatpush1.bf16.msra.mxu0 %v1213_v33 }
  0x1a   : > { %977 = vmatprep.subr.bf16.mxu0 %v1216_v34 }
  0x1d   : > { %979 = vmatpush1.bf16.msra.mxu0 %v1231_v39 }
  0x1e   : > { %981 = vmatprep.subr.bf16.mxu0 %v1234_v40 }
  0x21   : > { %983 = vmatpush1.bf16.msra.mxu0 %v1249_v45 }
  0x22   : > { %985 = vmatprep.subr.bf16.mxu0 %v1252_v46 }
  0x25   : > { %987 = vmatpush1.bf16.msra.mxu0 %v986_v49 }
  0x26   : > { %1021 = vmatprep.subr.bf16.mxu0 %v1116_v3 }
  0x28   : > { %237 = vmatmul.mubr.f32.vlgmr.msra.gmra.mrb[0].mxu0 %v1190_v26 }
  0x29   : > { %1023 = vmatpush1.bf16.msra.mxu0 %v1129_v8  ;;  %687 = vmatprep.mubr.f32.mxu0 %v1082_v7 }
  0x2a   : > { %1025 = vmatprep.subr.bf16.mxu0 %v1131_v9 }
  0x2d   : > { %1027 = vmatpush1.bf16.msra.mxu0 %v1149_v14 }
  0x2e   : > { %1029 = vmatprep.subr.bf16.mxu0 %v1153_v15 }
  0x31   : > { %1031 = vmatpush1.bf16.msra.mxu0 %v1173_v20 }
  0x32   : > { %1033 = vmatprep.subr.bf16.mxu0 %v1176_v21 }
  0x35   : > { %1035 = vmatpush1.bf16.msra.mxu0 %v1194_v27 }
  0x36   : > { %1037 = vmatprep.subr.bf16.mxu0 %v1198_v28 }
  0x39   : > { %1039 = vmatpush1.bf16.msra.mxu0 %v1213_v33 }
  0x3a   : > { %1041 = vmatprep.subr.bf16.mxu0 %v1216_v34 }
  0x3d   : > { %1043 = vmatpush1.bf16.msra.mxu0 %v1231_v39 }
  0x3e   : > { %1045 = vmatprep.subr.bf16.mxu0 %v1234_v40 }
  0x41   : > { %1047 = vmatpush1.bf16.msra.mxu0 %v1249_v45 }
  0x42   : > { %1049 = vmatprep.subr.bf16.mxu0 %v1252_v46 }
  0x45   : > { %1051 = vmatpush1.bf16.msra.mxu0 %v986_v49 }
  0xfb   : > { %v238_v50 = vpop.f32.mrb[0].mxu0 }
  0xfc   : > { %v240_v51 = vpop.f32.mrb[1].mxu0  ;;  %929 = vmatmul.mubr.f32.vlgmr.msra.gmra.mrb[0].mxu1 %v238_v50 }
  0xfd   : > { %932 = vmatpush3.msra.mxu1 %v240_v51  ;;  %933 = vmatprep.mubr.msk.f32.mxu1 %vm1083_vm0, %v1082_v7 }
  0xfe   : > { %989 = vmatprep.subr.bf16.mxu1 %v1116_v3 }
 0x1cf   : > { %v309_v52 = vpop.f32.mrb[0].mxu1 }
 0x1d0   : > { %v930_v53 = vpop.f32.mrb[1].mxu1  ;;  %v314_v54 = vsel %vm313_vm1, %v309_v52, -inf }
 0x1d1   : > { %315 = vmax.xlane.f32.xlu0 %v314_v54 }
 0x25e   : > { %v316_v55 = vpop.xlane.xlu0 %315 }
 0x25f   : > { %v317_v56 = vsub.f32 %v309_v52, %v316_v55 }
 0x261   : > { %v318_v57 = vmul.f32 1.442695, %v317_v56 }
 0x263   : > { %1062 = vpow2.f32 %v318_v57 }
 0x26d   : > { %v1063_v58 = vpop.eup %1062 }
 0x26e   : > { %v320_v59 = vsel %vm313_vm1, %v1063_v58, 0.0 }
 0x26f   : > { %321 = vadd.xlane.f32.xlu0 %v320_v59 }
 0x2fc   : > { %v322_v60 = vpop.xlane.xlu0 %321 }
 0x2fd   : > { %1064 = vrcp.f32 %v322_v60 }
 0x307   : > { %v1065_v61 = vpop.eup %1064 }
 0x308   : > { %v324_v62 = vmul.f32 %v1065_v61, %v1063_v58 }
 0x30a   : > { %934 = vmatmul.mubr.msk.f32.vlgmr.msra.gmra.mrb[2].mxu1 %vm313_vm1, %v324_v62 }
 0x30b   : > { %991 = vmatpush1.bf16.msra.mxu1 %v1129_v8  ;;  %462 = vmatprep.mubr.f32.mxu1 %v1082_v7 }
 0x30c   : > { %993 = vmatprep.subr.bf16.mxu1 %v1131_v9 }
 0x30f   : > { %995 = vmatpush1.bf16.msra.mxu1 %v1149_v14 }
 0x310   : > { %997 = vmatprep.subr.bf16.mxu1 %v1153_v15 }
 0x313   : > { %999 = vmatpush1.bf16.msra.mxu1 %v1173_v20 }
 0x314   : > { %1001 = vmatprep.subr.bf16.mxu1 %v1176_v21 }
 0x317   : > { %1003 = vmatpush1.bf16.msra.mxu1 %v1194_v27 }
 0x318   : > { %1005 = vmatprep.subr.bf16.mxu1 %v1198_v28 }
 0x31b   : > { %1007 = vmatpush1.bf16.msra.mxu1 %v1213_v33 }
 0x31c   : > { %1009 = vmatprep.subr.bf16.mxu1 %v1216_v34 }
 0x31f   : > { %1011 = vmatpush1.bf16.msra.mxu1 %v1231_v39 }
 0x320   : > { %1013 = vmatprep.subr.bf16.mxu1 %v1234_v40 }
 0x323   : > { %1015 = vmatpush1.bf16.msra.mxu1 %v1249_v45 }
 0x324   : > { %1017 = vmatprep.subr.bf16.mxu1 %v1252_v46 }
 0x327   : > { %1019 = vmatpush1.bf16.msra.mxu1 %v986_v49 }
 0x328   : > { %936 = vmatprep.subr.mxu1 %v1082_v7 }
 0x3dd   : > { %v394_v63 = vpop.f32.mrb[2].mxu1 }
 0x3de   : > { %v935_v0 = vpop.f32.mrb[3].mxu1  ;;  %463 = vmatmul.mubr.f32.vlgmr.msra.gmra.mrb[4].mxu1 %v394_v63 }
 0x3df   : > { %937 = vmatpush3.xpose.msra.mxu1 %v394_v63  ;;  %938 = vmatprep.mubr.msk.f32.mxu1 %vm1083_vm0, %v1082_v7 }
 0x3e0   : > { %941 = vmatprep.subr.mxu1 %v1082_v7 }
 0x4b1   : > { %v464_v1 = vpop.f32.mrb[4].mxu1 }
 0x4b2   : > { %v466_v2 = vpop.f32.mrb[5].mxu1  ;;  %939 = vmatmul.mubr.f32.vlgmr.msra.gmra.mrb[6].mxu1 %v464_v1 }
 0x4b3   : > { %942 = vmatpush3.msra.mxu1 %v466_v2  ;;  %943 = vmatprep.mubr.msk.f32.mxu1 %vm1083_vm0, %v1082_v7 }
 0x4b4   : > { %946 = vmatprep.subr.mxu1 %v1082_v7 }
 0x585   : > { %v535_v3 = vpop.f32.mrb[6].mxu1 }
 0x586   : > { %v940_v4 = vpop.f32.mrb[7].mxu1  ;;  %v539_v5 = vsel %vm313_vm1, %v535_v3, -inf }
 0x587   : > { %540 = vmax.xlane.f32.xlu1 %v539_v5 }
 0x614   : > { %v541_v6 = vpop.xlane.xlu1 %540 }
 0x615   : > { %v542_v8 = vsub.f32 %v535_v3, %v541_v6 }
 0x617   : > { %v543_v9 = vmul.f32 1.442695, %v542_v8 }
 0x619   : > { %1066 = vpow2.f32 %v543_v9 }
 0x623   : > { %v1067_v10 = vpop.eup %1066 }
 0x624   : > { %v545_v11 = vsel %vm313_vm1, %v1067_v10, 0.0 }
 0x625   : > { %546 = vadd.xlane.f32.xlu1 %v545_v11 }
 0x6b2   : > { %v547_v12 = vpop.xlane.xlu1 %546 }
 0x6b3   : > { %1068 = vrcp.f32 %v547_v12 }
 0x6bd   : > { %v1069_v13 = vpop.eup %1068 }
 0x6be   : > { %v549_v14 = vmul.f32 %v1069_v13, %v1067_v10 }
 0x6c0   : > { %944 = vmatmul.mubr.msk.f32.vlgmr.msra.gmra.mrb[8].mxu1 %vm313_vm1, %v549_v14 }
 0x6c1   : > { %948 = vmatprep.mubr.msk.f32.mxu1 %vm1083_vm0, %v1082_v7 }
 0x793   : > { %v619_v15 = vpop.f32.mrb[8].mxu1 }
 0x794   : > { %v945_v16 = vpop.f32.mrb[9].mxu1  ;;  %688 = vmatmul.mubr.f32.vlgmr.msra.gmra.mrb[2].mxu0 %v619_v15  ;;  %947 = vmatpush3.xpose.msra.mxu1 %v619_v15 }
 0x795   : > { %951 = vmatprep.subr.mxu1 %v1082_v7 }
 0x867   : > { %v689_v17 = vpop.f32.mrb[2].mxu0 }
 0x868   : > { %v691_v18 = vpop.f32.mrb[3].mxu0  ;;  %949 = vmatmul.mubr.f32.vlgmr.msra.gmra.mrb[10].mxu1 %v689_v17 }
 0x869   : > { %952 = vmatpush3.msra.mxu1 %v691_v18  ;;  %953 = vmatprep.mubr.msk.f32.mxu1 %vm1083_vm0, %v1082_v7 }
 0x93b   : > { %v760_v19 = vpop.f32.mrb[10].mxu1 }
 0x93c   : > { %v950_v20 = vpop.f32.mrb[11].mxu1  ;;  %v764_v21 = vsel %vm313_vm1, %v760_v19, -inf }
 0x93d   : > { %765 = vmax.xlane.f32.xlu0 %v764_v21 }
 0x9ca   : > { %v766_v22 = vpop.xlane.xlu0 %765 }
 0x9cb   : > { %v767_v23 = vsub.f32 %v760_v19, %v766_v22 }
 0x9cd   : > { %v768_v24 = vmul.f32 1.442695, %v767_v23 }
 0x9cf   : > { %1070 = vpow2.f32 %v768_v24 }
 0x9d9   : > { %v1071_v25 = vpop.eup %1070 }
 0x9da   : > { %v770_v27 = vsel %vm313_vm1, %v1071_v25, 0.0 }
 0x9db   : > { %771 = vadd.xlane.f32.xlu1 %v770_v27 }
 0xa68   : > { %v772_v28 = vpop.xlane.xlu1 %771 }
 0xa69   : > { %1072 = vrcp.f32 %v772_v28 }
 0xa73   : > { %v1073_v29 = vpop.eup %1072 }
 0xa74   : > { %v774_v30 = vmul.f32 %v1073_v29, %v1071_v25 }
 0xa76   : > { %954 = vmatmul.mubr.msk.f32.vlgmr.msra.gmra.mrb[12].mxu1 %vm313_vm1, %v774_v30 }
 0xb49   : > { %v844_v7 = vpop.f32.mrb[12].mxu1 }
 0xb4a   : > { %v845_v31 = vadd.f32 %v844_v7, %v1190_v26  ;;  %v955_v32 = vpop.f32.mrb[13].mxu1 }
 0xb4c   : > { %848 = vst [vmem:[%s138_s30] sm:$0xff] %v845_v31 }
 0xb4d PF: > { %s12_s9 = sadd.s32 1, %s1080_s9  }
 0xb4e   : > { %p9_p4 = scmp.ge.s32.totalorder %s12_s9, 4  }
 0xb50   :  { %11 = sbr.rel (!%p9_p4) target bundleno = 1 (0x1), region = 58 }

</bundles_post_ra>
